<compile_context>
chip_gen: v5e
topology: v5e:2x2
jax: 0.10.0
libtpu: 0.0.40
codegen_flags: <defaults>
</compile_context>

<pallas_src>
import functools

import jax
import jax.numpy as jnp
from jax.experimental import pallas as pl
from jax.experimental.pallas import tpu as pltpu


# ------------------------------- helpers ----------------------------------- #

def _round_up(x, m):
    return ((x + m - 1) // m) * m


def _make_dropout_bits(seed, n_rows, h_pad):
    """uint32 random bits, one per output element (tile-unique by construction)."""
    key = jax.random.PRNGKey(seed)
    return jax.random.bits(key, (n_rows, h_pad), dtype=jnp.uint32)


# ----------------------------- Pallas kernel -------------------------------- #

def _stc_fused_kernel(*refs, num_parts, apply_dropout, keep_threshold, inv_keep_prob):
    """out = relu(sum_i x_i @ W_i), optionally followed by inverted dropout.

    refs layout:
      [bits_ref]                  (tm, H_pad) uint32   (only when apply_dropout)
      x_0 ... x_{P-1}             (tm, K_i)
      w_0 ... w_{P-1}             (K_i, H_pad)         (resident across all row tiles)
      o_ref                       (tm, H_pad)
    """
    idx = 0
    bits_ref = None
    if apply_dropout:
        bits_ref = refs[0]
        idx = 1
    x_refs = refs[idx:idx + num_parts]
    w_refs = refs[idx + num_parts:idx + 2 * num_parts]
    o_ref = refs[idx + 2 * num_parts]

    # Split matmul == matmul of the (virtual) concatenation; f32 accumulation on the MXU.
    acc = jnp.dot(x_refs[0][...], w_refs[0][...], preferred_element_type=jnp.float32)
    for i in range(1, num_parts):
        acc = acc + jnp.dot(x_refs[i][...], w_refs[i][...],
                            preferred_element_type=jnp.float32)
    h = jnp.maximum(acc, 0.0)

    if apply_dropout:
        # Integer threshold compare: keep with probability (1 - p).
        keep = bits_ref[...] >= jnp.uint32(keep_threshold)
        h = jnp.where(keep, h * jnp.float32(inv_keep_prob), 0.0)

    o_ref[...] = h.astype(o_ref.dtype)


# ------------------------------ JAX wrapper --------------------------------- #

def stc_encoder_forward(nodes, feature_table, neigh_feats_list, detaching_weight,
                        *, dropout_param=0.5, dropout_flag=True, training=False,
                        dropout_seed=0, row_tile=512, use_bf16=False):
    """Mirrors STC_encoder.forward.

    nodes            : (N,) int32 node ids
    feature_table    : (num_nodes, F) float32  (the `features` lookup)
    neigh_feats_list : list of (N, H) float32  (outputs of the external STC_layer)
    detaching_weight : (F + num_adj*H, H) float32
    """
    # Glue: embedding gather (plain JAX).  The concat is fused into the kernel below.
    self_feats = jnp.take(feature_table, nodes, axis=0)               # (N, F)
    parts = [self_feats] + [jnp.asarray(n) for n in neigh_feats_list]

    N = parts[0].shape[0]
    H = detaching_weight.shape[1]
    K_total = sum(p.shape[1] for p in parts)
    assert detaching_weight.shape[0] == K_total

    # Split the weight row-wise -> one block per concatenated input piece.
    w_parts = []
    off = 0
    for p_arr in parts:
        k = p_arr.shape[1]
        w_parts.append(detaching_weight[off:off + k, :])
        off += k

    # Lane-dense output: pad H to a multiple of 128 (zero columns sliced off afterwards;
    # relu(0)=0 and dropout(0)=0, so semantics are preserved).
    H_pad = _round_up(H, 128)
    if H_pad != H:
        w_parts = [jnp.pad(w, ((0, 0), (0, H_pad - H))) for w in w_parts]

    # Optional bf16 inputs (halves HBM bytes on this memory-bound op); accumulation is f32.
    compute_dtype = jnp.bfloat16 if use_bf16 else jnp.float32
    parts = [p.astype(compute_dtype) for p in parts]
    w_parts = [w.astype(compute_dtype) for w in w_parts]

    # Row tiling: multiple of 8 sublanes (or the full N for small batches).
    tm = row_tile if N >= row_tile else N
    grid = (pl.cdiv(N, tm),)

    p = float(dropout_param)
    apply_dropout = bool(dropout_flag) and bool(training) and p > 0.0
    keep_threshold = min(int(round(p * 2.0 ** 32)), 2 ** 32 - 1)
    inv_keep_prob = 1.0 / (1.0 - p) if p < 1.0 else 0.0

    inputs = []
    in_specs = []
    if apply_dropout:
        bits = _make_dropout_bits(dropout_seed, N, H_pad)
        inputs.append(bits)
        in_specs.append(pl.BlockSpec((tm, H_pad), lambda i: (i, 0)))
    for p_arr in parts:
        k = p_arr.shape[1]
        inputs.append(p_arr)
        in_specs.append(pl.BlockSpec((tm, k), lambda i: (i, 0)))
    for w in w_parts:
        k = w.shape[0]
        inputs.append(w)
        in_specs.append(pl.BlockSpec((k, H_pad), lambda i: (0, 0)))   # weight stays resident

    out_specs = pl.BlockSpec((tm, H_pad), lambda i: (i, 0))
    out_shape = jax.ShapeDtypeStruct((N, H_pad), jnp.float32)

    kernel = functools.partial(
        _stc_fused_kernel,
        num_parts=len(parts),
        apply_dropout=apply_dropout,
        keep_threshold=keep_threshold,
        inv_keep_prob=inv_keep_prob,
    )

    itemsize = jnp.dtype(compute_dtype).itemsize
    bytes_accessed = (itemsize * (N * K_total + K_total * H_pad)
                      + 4 * N * H_pad
                      + (4 * N * H_pad if apply_dropout else 0))
    cost = pl.CostEstimate(flops=2 * N * K_total * H_pad,
                           transcendentals=0,
                           bytes_accessed=int(bytes_accessed))

    out = pl.pallas_call(
        kernel,
        out_shape=out_shape,
        grid=grid,
        in_specs=in_specs,
        out_specs=out_specs,
        compiler_params=pltpu.CompilerParams(
            dimension_semantics=("parallel",),   # row tiles shard across v7x's 2 TCs
        ),
        cost_estimate=cost,
    )(*inputs)

    return out[:, :H] if H_pad != H else out


# --------------------------- deterministic setup ---------------------------- #

def xavier_uniform(key, shape, dtype=jnp.float32):
    fan_in, fan_out = shape
    bound = (6.0 / (fan_in + fan_out)) ** 0.5
    return jax.random.uniform(key, shape, dtype, minval=-bound, maxval=bound)


if __name__ == "__main__":
    key = jax.random.PRNGKey(0)
    k_feat, k_w, k_n0, k_n1, k_nodes = jax.random.split(key, 5)

    # Small, module-consistent shapes.
    num_graph_nodes = 32     # size of the feature lookup table
    feature_dim = 16         # feature_dim
    hidden_dim = 32          # hidden_dim
    num_adj = 2              # len(adjacent_lists)
    N = 8                    # batch of nodes passed to forward()

    feature_table = jax.random.normal(k_feat, (num_graph_nodes, feature_dim), jnp.float32)
    detaching_weight = xavier_uniform(
        k_w, (feature_dim + num_adj * hidden_dim, hidden_dim))
    nodes = jax.random.randint(k_nodes, (N,), 0, num_graph_nodes, dtype=jnp.int32)

    # TODO(synk): STC_layer.forward is an external module (spectral star-topology conv);
    # its per-adjacency-list outputs are synthesized here as (N, hidden_dim) features.
    neigh_feats_list = [
        jax.random.normal(k_n0, (N, hidden_dim), jnp.float32),
        jax.random.normal(k_n1, (N, hidden_dim), jnp.float32),
    ]

    # ---- eval-mode forward (F.dropout is identity when training=False) ----
    out = stc_encoder_forward(
        nodes, feature_table, neigh_feats_list, detaching_weight,
        dropout_param=0.5, dropout_flag=True, training=False,
    )
    out = jax.block_until_ready(out)

    self_feats = jnp.take(feature_table, nodes, axis=0)
    x_cat = jnp.concatenate([self_feats] + neigh_feats_list, axis=1)
    ref_eval = jnp.maximum(x_cat @ detaching_weight, 0.0)
    assert out.shape == (N, hidden_dim)
    assert jnp.allclose(out, ref_eval, atol=1e-4, rtol=1e-4), "eval mismatch vs reference"

    # ---- training-mode forward (inverted dropout fused into the kernel) ----
    p_drop = 0.5
    seed = 123
    out_train = stc_encoder_forward(
        nodes, feature_table, neigh_feats_list, detaching_weight,
        dropout_param=p_drop, dropout_flag=True, training=True, dropout_seed=seed,
    )
    out_train = jax.block_until_ready(out_train)

    H_pad = _round_up(hidden_dim, 128)
    bits = _make_dropout_bits(seed, N, H_pad)[:, :hidden_dim]
    thr = jnp.uint32(min(int(round(p_drop * 2.0 ** 32)), 2 ** 32 - 1))
    ref_train = jnp.where(bits >= thr, ref_eval / (1.0 - p_drop), 0.0)
    assert out_train.shape == (N, hidden_dim)
    assert jnp.allclose(out_train, ref_train, atol=1e-4, rtol=1e-4), \
        "training mismatch vs reference"

    print("KERNEL_OK")
</pallas_src>

<mosaic_0001>
module attributes {stable_mosaic.version = 11 : i64} {
  func.func @_stc_fused_kernel(%arg0: i32, %arg1: memref<8x16xf32, #tpu.memory_space<vmem>>, %arg2: memref<8x32xf32, #tpu.memory_space<vmem>>, %arg3: memref<8x32xf32, #tpu.memory_space<vmem>>, %arg4: memref<16x128xf32, #tpu.memory_space<vmem>>, %arg5: memref<32x128xf32, #tpu.memory_space<vmem>>, %arg6: memref<32x128xf32, #tpu.memory_space<vmem>>, %arg7: memref<8x128xf32, #tpu.memory_space<vmem>>) attributes {dimension_semantics = [#tpu.dimension_semantics<parallel>], iteration_bounds = array<i64: 1>, scalar_prefetch = 0 : i64, scratch_operands = 0 : i64, tpu.core_type = #tpu.core_type<tc>, window_params = [{transform_indices = @transform_0, window_bounds = array<i64: 8, 16>}, {transform_indices = @transform_1, window_bounds = array<i64: 8, 32>}, {transform_indices = @transform_2, window_bounds = array<i64: 8, 32>}, {pipeline_mode = #tpu.pipeline_mode<synchronous>, transform_indices = @transform_3, window_bounds = array<i64: 16, 128>}, {pipeline_mode = #tpu.pipeline_mode<synchronous>, transform_indices = @transform_4, window_bounds = array<i64: 32, 128>}, {pipeline_mode = #tpu.pipeline_mode<synchronous>, transform_indices = @transform_5, window_bounds = array<i64: 32, 128>}, {transform_indices = @transform_6, window_bounds = array<i64: 8, 128>}]} {
    %c0 = arith.constant 0 : index
    %c0_0 = arith.constant 0 : index
    %0 = vector.load %arg1[%c0, %c0_0] : memref<8x16xf32, #tpu.memory_space<vmem>>, vector<8x16xf32>
    %c0_1 = arith.constant 0 : index
    %c0_2 = arith.constant 0 : index
    %1 = vector.load %arg4[%c0_1, %c0_2] : memref<16x128xf32, #tpu.memory_space<vmem>>, vector<16x128xf32>
    %cst = arith.constant dense<0.000000e+00> : vector<8x128xf32>
    %2 = tpu.matmul %0, %1, %cst {dimension_numbers = #tpu.dot_dimension_numbers<[1], [0], [0], [1], [0, 0, 1, 1], [], []>} : vector<8x16xf32>, vector<16x128xf32>, vector<8x128xf32> -> vector<8x128xf32>
    %c0_3 = arith.constant 0 : index
    %c0_4 = arith.constant 0 : index
    %3 = vector.load %arg2[%c0_3, %c0_4] : memref<8x32xf32, #tpu.memory_space<vmem>>, vector<8x32xf32>
    %c0_5 = arith.constant 0 : index
    %c0_6 = arith.constant 0 : index
    %4 = vector.load %arg5[%c0_5, %c0_6] : memref<32x128xf32, #tpu.memory_space<vmem>>, vector<32x128xf32>
    %cst_7 = arith.constant dense<0.000000e+00> : vector<8x128xf32>
    %5 = tpu.matmul %3, %4, %cst_7 {dimension_numbers = #tpu.dot_dimension_numbers<[1], [0], [0], [1], [0, 0, 1, 1], [], []>} : vector<8x32xf32>, vector<32x128xf32>, vector<8x128xf32> -> vector<8x128xf32>
    %6 = arith.addf %2, %5 : vector<8x128xf32>
    %c0_8 = arith.constant 0 : index
    %c0_9 = arith.constant 0 : index
    %7 = vector.load %arg3[%c0_8, %c0_9] : memref<8x32xf32, #tpu.memory_space<vmem>>, vector<8x32xf32>
    %c0_10 = arith.constant 0 : index
    %c0_11 = arith.constant 0 : index
    %8 = vector.load %arg6[%c0_10, %c0_11] : memref<32x128xf32, #tpu.memory_space<vmem>>, vector<32x128xf32>
    %cst_12 = arith.constant dense<0.000000e+00> : vector<8x128xf32>
    %9 = tpu.matmul %7, %8, %cst_12 {dimension_numbers = #tpu.dot_dimension_numbers<[1], [0], [0], [1], [0, 0, 1, 1], [], []>} : vector<8x32xf32>, vector<32x128xf32>, vector<8x128xf32> -> vector<8x128xf32>
    %10 = arith.addf %6, %9 : vector<8x128xf32>
    %cst_13 = arith.constant 0.000000e+00 : f32
    %11 = vector.broadcast %cst_13 : f32 to vector<8x128xf32>
    %12 = arith.maximumf %10, %11 : vector<8x128xf32>
    %c0_14 = arith.constant 0 : index
    %c0_15 = arith.constant 0 : index
    %13 = vector.load %arg7[%c0_14, %c0_15] : memref<8x128xf32, #tpu.memory_space<vmem>>, vector<8x128xf32>
    tpu.vector_store %arg7[%c0_14, %c0_15], %12 {strides = array<i32>} : memref<8x128xf32, #tpu.memory_space<vmem>>, vector<8x128xf32>,
    return
  }
  func.func @transform_0(%arg0: i32) -> (i32, i32) {
    %c0_i32 = arith.constant 0 : i32
    %c0_i32_0 = arith.constant 0 : i32
    return %arg0, %c0_i32 : i32, i32
  }
  func.func @transform_1(%arg0: i32) -> (i32, i32) {
    %c0_i32 = arith.constant 0 : i32
    %c0_i32_0 = arith.constant 0 : i32
    return %arg0, %c0_i32 : i32, i32
  }
  func.func @transform_2(%arg0: i32) -> (i32, i32) {
    %c0_i32 = arith.constant 0 : i32
    %c0_i32_0 = arith.constant 0 : i32
    return %arg0, %c0_i32 : i32, i32
  }
  func.func @transform_3(%arg0: i32) -> (i32, i32) {
    %c0_i32 = arith.constant 0 : i32
    %c0_i32_0 = arith.constant 0 : i32
    %c0_i32_1 = arith.constant 0 : i32
    return %c0_i32, %c0_i32_0 : i32, i32
  }
  func.func @transform_4(%arg0: i32) -> (i32, i32) {
    %c0_i32 = arith.constant 0 : i32
    %c0_i32_0 = arith.constant 0 : i32
    %c0_i32_1 = arith.constant 0 : i32
    return %c0_i32, %c0_i32_0 : i32, i32
  }
  func.func @transform_5(%arg0: i32) -> (i32, i32) {
    %c0_i32 = arith.constant 0 : i32
    %c0_i32_0 = arith.constant 0 : i32
    %c0_i32_1 = arith.constant 0 : i32
    return %c0_i32, %c0_i32_0 : i32, i32
  }
  func.func @transform_6(%arg0: i32) -> (i32, i32) {
    %c0_i32 = arith.constant 0 : i32
    %c0_i32_0 = arith.constant 0 : i32
    return %arg0, %c0_i32 : i32, i32
  }
}

</mosaic_0001>

<bundles_post_ra>
// kernel: tpu_custom_call.1
= control target key start
LH: loop header
LB: loop body
LE: loop exit
PB: predicated region body
PF: predicated region fallthrough
CT: control target
= control target key end

     0   :  { %11 = vsyncpa [#allocation3], 0  ;;  %s474_s0 = inlined_call_operand.hbm [shape: f32[8,16], index: 0, kind: input, shape index: {}]   ;;  %s475_s1 = inlined_call_operand.hbm [shape: f32[8,32], index: 1, kind: input, shape index: {}]   ;;  %s476_s2 = inlined_call_operand.hbm [shape: f32[8,32], index: 2, kind: input, shape index: {}]   ;;  %s477_s3 = inlined_call_operand.hbm [shape: f32[16,128], index: 3, kind: input, shape index: {}]   ;;  %s478_s4 = inlined_call_operand.hbm [shape: f32[32,128], index: 4, kind: input, shape index: {}]   ;;  %s479_s5 = inlined_call_operand.hbm [shape: f32[32,128], index: 5, kind: input, shape index: {}]   ;;  %s480_s6 = inlined_call_operand.hbm [shape: f32[8,128], index: 6, kind: output, shape index: {}]  }
   0x1   :  { %12 = vsyncpa [#allocation6], 0 }
   0x2   :  { %13 = vsyncpa [#allocation9], 0 }
   0x3   :  { %14 = vsyncpa [#allocation12], 0  ;;  %s32_s23 = sshll.u32 %s475_s1, 4  ;;  %s33_s23 = int_to_ptr.hbm [resolvable:$true] %s32_s23 }
   0x4   :  { %15 = vsyncpa [#allocation4], 0  ;;  %s409_s24 = smov [#allocation5]   ;;  %s53_s28 = sshll.u32 %s477_s3, 4  ;;  %s54_s28 = int_to_ptr.hbm [resolvable:$true] %s53_s28 }
   0x5   :  { %s34_s25 = sshll.u32 %s409_s24, 4  ;;  %s410_s29 = smov [#allocation8]   ;;  %s35_s25 = int_to_ptr.vmem [resolvable:$true] %s34_s25 }
   0x6   :  { %37 = dma.hbm_to_vmem [thread:$0]  %s33_s23, 128, %s35_s25, [#allocation6]  }
   0x7   :  { %s55_s30 = sshll.u32 %s410_s29, 4  ;;  %s411_s7 = smov 128   ;;  %s56_s30 = int_to_ptr.vmem [resolvable:$true] %s55_s30 }
   0x8   :  { %s412_s8 = smov 8   ;;  %s21_s1 = sshll.u32 %s474_s0, 4  ;;  %s22_s1 = int_to_ptr.hbm [resolvable:$true] %s21_s1 }
   0x9   :  { %61 = dma.hbm_to_vmem [thread:$0]  %s54_s28, 256, %s56_s30, [#allocation9], %s411_s7, %s411_s7, %s412_s8  }
   0xa   :  { %s413_s11 = smov [#allocation2]   ;;  %s43_s3 = sshll.u32 %s476_s2, 4  ;;  %s44_s3 = int_to_ptr.hbm [resolvable:$true] %s43_s3 }
   0xb   :  { %s23_s12 = sshll.u32 %s413_s11, 4  ;;  %s414_s15 = smov [#allocation7]   ;;  %s24_s12 = int_to_ptr.vmem [resolvable:$true] %s23_s12 }
   0xc   :  { %26 = dma.hbm_to_vmem [thread:$0]  %s22_s1, 128, %s24_s12, [#allocation3]  }
   0xd   :  { %s45_s16 = sshll.u32 %s414_s15, 4  ;;  %s66_s19 = sshll.u32 %s478_s4, 4  ;;  %s46_s16 = int_to_ptr.vmem [resolvable:$true] %s45_s16  ;;  %s67_s19 = int_to_ptr.hbm [resolvable:$true] %s66_s19 }
   0xe   :  { %48 = dma.hbm_to_vmem [thread:$0]  %s44_s3, 128, %s46_s16, [#allocation6]  }
   0xf   :  { %s79_s21 = sshll.u32 %s479_s5, 4  ;;  %s415_s22 = smov [#allocation10]   ;;  %s80_s21 = int_to_ptr.hbm [resolvable:$true] %s79_s21 }
  0x10   :  { %s68_s23 = sshll.u32 %s415_s22, 4  ;;  %s416_s2 = smov [#allocation11]   ;;  %s69_s23 = int_to_ptr.vmem [resolvable:$true] %s68_s23 }
  0x11   :  { %74 = dma.hbm_to_vmem [thread:$0]  %s67_s19, 512, %s69_s23, [#allocation9], %s411_s7, %s411_s7, %s412_s8  }
  0x12   :  { %s81_s24 = sshll.u32 %s416_s2, 4  ;;  %s82_s24 = int_to_ptr.vmem [resolvable:$true] %s81_s24 }
  0x13   :  { %87 = dma.hbm_to_vmem [thread:$0]  %s80_s21, 512, %s82_s24, [#allocation12], %s411_s7, %s411_s7, %s412_s8  }
  0x14   :  { %399 = dma.done.wait [#allocation3], 128  }
  0x15   :  { %400 = vsyncadd [#allocation3], 4294967168 }
  0x16   :  { %401 = dma.done.wait [#allocation6], 256  }
  0x17   :  { %402 = vsyncadd [#allocation6], 4294967040 }
  0x18   :  { %403 = dma.done.wait [#allocation9], 768  }
  0x19   :  { %404 = vsyncadd [#allocation9], 4294966528 }
  0x1a   :  { %405 = dma.done.wait [#allocation12], 512  }
  0x1b   :  { %406 = vsyncadd [#allocation12], 4294966784  ;;  %v172_v0 = vld [vmem:[#allocation11 + $0x18] sm:$0xff]  ;;  %v171_v1 = vld [vmem:[#allocation11 + $0x10] sm:$0xff]  ;;  %vm120_vm0 = vcmask 261120   ;;  %vm144_vm1 = vcmask 130048  }
  0x1c   :  { %v119_v2 = vld [vmem:[#allocation10 + $0x18] sm:$0xff]  ;;  %188 = vmatpush.msra.mxu2 %v172_v0  ;;  %v118_v3 = vld [vmem:[#allocation10 + $0x10] sm:$0xff]  ;;  %v170_v4 = vld [vmem:[#allocation11 + $0x8] sm:$0xff]  ;;  %s417_s4 = smov [#allocation13]   ;;  %s206_s27 = sshll.u32 %s480_s6, 4  ;;  %s207_s27 = int_to_ptr.hbm [resolvable:$true] %s206_s27 }
  0x1d   :  { %136 = vmatpush.msra.mxu0 %v119_v2  ;;  %v117_v5 = vld [vmem:[#allocation10 + $0x8] sm:$0xff]  ;;  %v114_v6 = vld [vmem:[#allocation8 + $0x8] sm:$0xff]  ;;  %v113_v7 = vld [vmem:[#allocation8] sm:$0xff]  ;;  %s204_s5 = sshll.u32 %s417_s4, 4  ;;  %s205_s5 = int_to_ptr.vmem [resolvable:$true] %s204_s5 }
  0x1e   :  { %189 = vmatpush.msra.mxu2 %v171_v1  ;;  %v169_v8 = vld [vmem:[#allocation11] sm:$0xff]  ;;  %162 = vmatpush.msra.mxu1 %v114_v6  ;;  %v168_v10 = vld [vmem:[#allocation7] sm:$0xff]  ;;  %v112_v12 = vld [vmem:[#allocation2] sm:$0xff] }
  0x1f   :  { %137 = vmatpush.msra.mxu0 %v118_v3  ;;  %v116_v9 = vld [vmem:[#allocation10] sm:$0xff] }
  0x20   :  { %190 = vmatpush.msra.mxu2 %v170_v4  ;;  %v115_v11 = vld [vmem:[#allocation5] sm:$0xff]  ;;  %163 = vmatpush.msra.mxu1 %v113_v7 }
  0x21   :  { %138 = vmatpush.msra.mxu0 %v117_v5  ;;  %220 = vmatmul.msk.f32.vlgmr.msra.gmra.mxu1 %vm144_vm1, %v112_v12 }
  0x22   :  { %191 = vmatpush.msra.mxu2 %v169_v8 }
  0x23   :  { %139 = vmatpush.msra.mxu0 %v116_v9  ;;  %221 = vmatmul.msk.f32.vlgmr.msra.gmra.mxu2 %vm120_vm0, %v168_v10 }
  0x24   :  { %219 = vmatmul.msk.f32.vlgmr.msra.gmra.mxu0 %vm120_vm0, %v115_v11 }
  0x9e   :  { %v165_v14 = vpop.f32.mrf.mxu1 }
  0xa1   :  { %v141_v13 = vpop.f32.mrf.mxu0 }
  0xa2   :  { %v166_v15 = vadd.f32 %v165_v14, %v141_v13 }
  0xa6   :  { %v193_v16 = vpop.f32.mrf.mxu2 }
  0xa7   :  { %v196_v17 = vadd.f32 %v193_v16, %v166_v15 }
  0xa9   :  { %v197_v18 = vmax.f32 %v196_v17, 0.0 }
  0xab   :  { %198 = vst [vmem:[#allocation13] sm:$0xff] %v197_v18 }
  0xac   :  { %209 = dma.vmem_to_hbm [thread:$0]  %s205_s5, 128, %s207_s27, [#allocation4]  }
  0xad   :  { %407 = dma.done.wait [#allocation4], 128  }
  0xae   :  { %408 = vsyncadd [#allocation4], 4294967168 }
  0xaf   :  { %214 = vsyncpa [#allocation3], 1 }
  0xb0   :  { %215 = vsyncpa [#allocation6], 1 }
  0xb1   :  { %216 = vsyncpa [#allocation9], 1 }
  0xb2   :  { %217 = vsyncpa [#allocation12], 1 }
  0xb3   :  { %218 = vsyncpa [#allocation4], 1 }

</bundles_post_ra>
